<compile_context>
chip_gen: v5e
topology: v5e:2x2
jax: 0.10.0
libtpu: 0.0.40
codegen_flags: <defaults>
</compile_context>

<pallas_src>
import functools

import numpy as np
import jax
import jax.numpy as jnp
from jax.experimental import pallas as pl
from jax.experimental.pallas import tpu as pltpu


def _pool_matrix_w(W):
    """(W, Wo) per-window column-mean weights for AvgPool1d(2, stride 2,
    ceil_mode=True, count_include_pad=False): 0.5/0.5 for full pairs and 1.0
    for the odd ceil-mode tail column.  Built from iota (no constant capture)."""
    Wo = (W + 1) // 2
    w = jax.lax.broadcasted_iota(jnp.int32, (W, Wo), 0)
    j = jax.lax.broadcasted_iota(jnp.int32, (W, Wo), 1)
    hit = (w == 2 * j) | (w == 2 * j + 1)
    if W % 2 == 1:
        weight = jnp.where(w == W - 1, jnp.float32(1.0), jnp.float32(0.5))
    else:
        weight = jnp.float32(0.5)
    return jnp.where(hit, weight, jnp.float32(0.0))


def _pool_level(src_ref, dst_ref, H, W):
    """One AvgPool2d(2,2,count_include_pad=False,ceil_mode=True) level.

    src_ref: (TN, H, W)  ->  dst_ref: (TN, ceil(H/2), ceil(W/2)).
    The count_include_pad=False window mean factorizes into a row-mean (over
    the 1 or 2 real rows) followed by a column-mean (over the 1 or 2 real
    columns), so the result is exact."""
    He, Wo = H // 2, (W + 1) // 2
    tn = src_ref.shape[0]
    pw = _pool_matrix_w(W) if W > 1 else None

    def pool_w(rows, nrows):  # rows: (tn, nrows, W) f32 -> (tn, nrows, Wo) f32
        if W == 1:
            return rows
        y = jnp.dot(rows.reshape(tn * nrows, W), pw,
                    preferred_element_type=jnp.float32)
        return y.reshape(tn, nrows, Wo)

    if He > 0:  # full 2-row windows: stride-2 sublane reads, f32 cast folded in
        a = src_ref[:, pl.ds(0, He, 2), :].astype(jnp.float32)   # rows 0,2,4,...
        b = src_ref[:, pl.ds(1, He, 2), :].astype(jnp.float32)   # rows 1,3,5,...
        dst_ref[:, 0:He, :] = pool_w((a + b) * 0.5, He).astype(dst_ref.dtype)
    if H % 2 == 1:  # ceil_mode tail row (single real row) -> separate slice store
        tail = src_ref[:, H - 1:H, :].astype(jnp.float32)
        dst_ref[:, He:He + 1, :] = pool_w(tail, 1).astype(dst_ref.dtype)


def _fused_avgpool_kernel(x_ref, o1_ref, o2_ref, o3_ref, *, H, W, sizes):
    (H1, W1), (H2, W2), _ = sizes
    _pool_level(x_ref, o1_ref, H, W)        # s1
    _pool_level(o1_ref, o2_ref, H1, W1)     # s2 (re-reads the freshly written o1 block)
    _pool_level(o2_ref, o3_ref, H2, W2)     # s3


def _vmem_limit_bytes():
    cap = 64 * 1024 * 1024                  # conservative fallback = v7x physical VMEM
    try:
        cap = int(pltpu.get_tpu_info().vmem_capacity_bytes)
    except Exception:
        pass
    # ~5/8 of physical, capped: ~40 MiB on v7x (64 MiB), ~80 MiB on v5e/v6e (128 MiB).
    return int(min(cap * 5 // 8, 96 * 1024 * 1024))


def _plan_tiles(N, H, W, sizes):
    """Pick planes-per-step TN and the grid length.

    TN is capped by a VMEM budget that counts double-buffered I/O blocks and
    in-kernel f32 temporaries ((8,128)-tile-padded footprints), and also capped
    so the grid has >= ~4 (and preferably an even number of) steps."""
    def pad_bytes(h, w):  # f32 (8,128)-tile-padded footprint per plane
        return (-(-h // 8) * 8) * (-(-w // 128) * 128) * 4

    in_b = pad_bytes(H, W)
    out_b = sum(pad_bytes(h, w) for h, w in sizes)
    per_plane = 4 * (in_b + out_b)          # 2x double-buffered I/O + ~2x f32 temporaries
    vmem_limit = _vmem_limit_bytes()
    budget = (vmem_limit * 3) // 4
    tn_max = max(1, budget // per_plane)
    # TODO(synk): if even TN=1 exceeds the budget (enormous H*W) this kernel would
    # additionally need H-tiling; not required for these shapes.
    target_steps = 4
    tn = int(min(tn_max, max(1, -(-N // target_steps))))
    steps = -(-N // tn)
    if steps > 1 and steps % 2 == 1 and tn > 1:   # prefer an even step count (v7x 2-TC)
        tn_alt = max(1, -(-N // (steps + 1)))
        if (-(-N // tn_alt)) % 2 == 0:
            tn, steps = tn_alt, -(-N // tn_alt)
    return tn, steps, vmem_limit


def _avgpool_forward_impl(s0):
    lead = s0.shape[:-2]
    H, W = s0.shape[-2:]
    N = 1
    for d in lead:
        N *= d

    # Native NCHW layout: only free leading-dim reshapes, no transpose / pad.
    x = s0.reshape((N, H, W))

    sizes = []
    h, w = H, W
    for _ in range(3):
        h, w = (h + 1) // 2, (w + 1) // 2
        sizes.append((h, w))
    sizes = tuple(sizes)

    tn, steps, vmem_limit = _plan_tiles(N, H, W, sizes)

    kernel = functools.partial(_fused_avgpool_kernel, H=H, W=W, sizes=sizes)
    out_shape = tuple(jax.ShapeDtypeStruct((N, hk, wk), s0.dtype) for hk, wk in sizes)
    # Blocks are full in the last two dims (always legal w.r.t. the (8,128) rule);
    # the plane axis is a leading dim, so partial final blocks are handled by Pallas.
    in_specs = [pl.BlockSpec((tn, H, W), lambda g: (g, 0, 0))]
    out_specs = tuple(
        pl.BlockSpec((tn, hk, wk), lambda g: (g, 0, 0)) for hk, wk in sizes
    )

    s1, s2, s3 = pl.pallas_call(
        kernel,
        out_shape=out_shape,
        grid=(steps,),
        in_specs=in_specs,
        out_specs=out_specs,
        compiler_params=pltpu.CompilerParams(
            dimension_semantics=("parallel",),
            vmem_limit_bytes=vmem_limit,
        ),
    )(x)

    def unpack(y):
        return y.reshape(lead + y.shape[1:])

    return unpack(s1), unpack(s2), unpack(s3)


# Mirror of AvgPool.forward: works for (B,C,H,W) and (B,T,C,H,W).
avgpool_forward = jax.jit(_avgpool_forward_impl)


def _ref_pool_np(x):
    """numpy reference for AvgPool2d(2,2,count_include_pad=False,ceil_mode=True)."""
    H, W = x.shape[-2:]
    Ho, Wo = (H + 1) // 2, (W + 1) // 2
    out = np.zeros(x.shape[:-2] + (Ho, Wo), dtype=np.float32)
    for i in range(Ho):
        for j in range(Wo):
            hs = slice(2 * i, min(2 * i + 2, H))
            ws = slice(2 * j, min(2 * j + 2, W))
            out[..., i, j] = x[..., hs, ws].mean(axis=(-2, -1))
    return out


if __name__ == "__main__":
    key = jax.random.PRNGKey(0)

    # 4-D single-frame path (B, C, H, W)
    x4 = jax.random.normal(key, (2, 4, 16, 16), dtype=jnp.float32)
    s1, s2, s3 = avgpool_forward(x4)
    jax.block_until_ready((s1, s2, s3))

    # 5-D time-series path (B, T, C, H, W); odd spatial dims exercise ceil_mode
    x5 = jax.random.normal(jax.random.fold_in(key, 1), (2, 3, 4, 15, 15), dtype=jnp.float32)
    t1, t2, t3 = avgpool_forward(x5)
    jax.block_until_ready((t1, t2, t3))

    # odd sizes that stay odd at level 2 as well (13 -> 7 -> 4 -> 2)
    x13 = jax.random.normal(jax.random.fold_in(key, 2), (2, 4, 13, 13), dtype=jnp.float32)
    u1, u2, u3 = avgpool_forward(x13)
    jax.block_until_ready((u1, u2, u3))

    # correctness vs numpy reference
    for x, outs in ((x4, (s1, s2, s3)), (x5, (t1, t2, t3)), (x13, (u1, u2, u3))):
        r = np.asarray(x)
        for got in outs:
            r = _ref_pool_np(r)
            np.testing.assert_allclose(np.asarray(got), r, rtol=1e-5, atol=1e-5)

    assert s1.shape == (2, 4, 8, 8) and s2.shape == (2, 4, 4, 4) and s3.shape == (2, 4, 2, 2)
    assert t1.shape == (2, 3, 4, 8, 8) and t2.shape == (2, 3, 4, 4, 4) and t3.shape == (2, 3, 4, 2, 2)
    assert u1.shape == (2, 4, 7, 7) and u2.shape == (2, 4, 4, 4) and u3.shape == (2, 4, 2, 2)
    print("KERNEL_OK")
</pallas_src>

<mosaic_0001>
module attributes {stable_mosaic.version = 11 : i64} {
  func.func @_fused_avgpool_kernel(%arg0: i32, %arg1: memref<2x16x16xf32, #tpu.memory_space<vmem>>, %arg2: memref<2x8x8xf32, #tpu.memory_space<vmem>>, %arg3: memref<2x4x4xf32, #tpu.memory_space<vmem>>, %arg4: memref<2x2x2xf32, #tpu.memory_space<vmem>>) attributes {dimension_semantics = [#tpu.dimension_semantics<parallel>], iteration_bounds = array<i64: 4>, scalar_prefetch = 0 : i64, scratch_operands = 0 : i64, tpu.core_type = #tpu.core_type<tc>, window_params = [{transform_indices = @transform_0, window_bounds = array<i64: 2, 16, 16>}, {transform_indices = @transform_1, window_bounds = array<i64: 2, 8, 8>}, {transform_indices = @transform_2, window_bounds = array<i64: 2, 4, 4>}, {transform_indices = @transform_3, window_bounds = array<i64: 2, 2, 2>}]} {
    %0 = tpu.iota {dimensions = array<i32: 0>} : vector<16x8xi32>
    %1 = tpu.iota {dimensions = array<i32: 1>} : vector<16x8xi32>
    %c2_i32 = arith.constant 2 : i32
    %2 = vector.broadcast %c2_i32 : i32 to vector<16x8xi32>
    %3 = arith.muli %2, %1 : vector<16x8xi32>
    %4 = arith.cmpi eq, %0, %3 : vector<16x8xi32>
    %c2_i32_0 = arith.constant 2 : i32
    %5 = vector.broadcast %c2_i32_0 : i32 to vector<16x8xi32>
    %6 = arith.muli %5, %1 : vector<16x8xi32>
    %c1_i32 = arith.constant 1 : i32
    %7 = vector.broadcast %c1_i32 : i32 to vector<16x8xi32>
    %8 = arith.addi %6, %7 : vector<16x8xi32>
    %9 = arith.cmpi eq, %0, %8 : vector<16x8xi32>
    %10 = arith.ori %4, %9 : vector<16x8xi1>
    %cst = arith.constant 5.000000e-01 : f32
    %cst_1 = arith.constant 0.000000e+00 : f32
    %11 = vector.broadcast %cst : f32 to vector<16x8xf32>
    %12 = vector.broadcast %cst_1 : f32 to vector<16x8xf32>
    %13 = arith.select %10, %11, %12 : vector<16x8xi1>, vector<16x8xf32>
    %c0 = arith.constant 0 : index
    %c0_2 = arith.constant 0 : index
    %c0_3 = arith.constant 0 : index
    %14 = tpu.strided_load %arg1[%c0, %c0_2, %c0_3] {strides = array<i32: 1, 2, 1>} : memref<2x16x16xf32, #tpu.memory_space<vmem>>, vector<2x8x16xf32>
    %c0_4 = arith.constant 0 : index
    %c1 = arith.constant 1 : index
    %c0_5 = arith.constant 0 : index
    %15 = tpu.strided_load %arg1[%c0_4, %c1, %c0_5] {strides = array<i32: 1, 2, 1>} : memref<2x16x16xf32, #tpu.memory_space<vmem>>, vector<2x8x16xf32>
    %16 = arith.addf %14, %15 : vector<2x8x16xf32>
    %cst_6 = arith.constant 5.000000e-01 : f32
    %17 = vector.broadcast %cst_6 : f32 to vector<2x8x16xf32>
    %18 = arith.mulf %16, %17 : vector<2x8x16xf32>
    %19 = vector.shape_cast %18 : vector<2x8x16xf32> to vector<16x16xf32>
    %cst_7 = arith.constant dense<0.000000e+00> : vector<16x8xf32>
    %20 = tpu.matmul %19, %13, %cst_7 {dimension_numbers = #tpu.dot_dimension_numbers<[1], [0], [0], [1], [0, 0, 1, 1], [], []>} : vector<16x16xf32>, vector<16x8xf32>, vector<16x8xf32> -> vector<16x8xf32>
    %21 = vector.shape_cast %20 : vector<16x8xf32> to vector<2x8x8xf32>
    %c0_8 = arith.constant 0 : index
    %c0_9 = arith.constant 0 : index
    %c0_10 = arith.constant 0 : index
    %22 = vector.load %arg2[%c0_8, %c0_9, %c0_10] : memref<2x8x8xf32, #tpu.memory_space<vmem>>, vector<2x8x8xf32>
    tpu.vector_store %arg2[%c0_8, %c0_9, %c0_10], %21 {strides = array<i32>} : memref<2x8x8xf32, #tpu.memory_space<vmem>>, vector<2x8x8xf32>,
    %23 = tpu.iota {dimensions = array<i32: 0>} : vector<8x4xi32>
    %24 = tpu.iota {dimensions = array<i32: 1>} : vector<8x4xi32>
    %c2_i32_11 = arith.constant 2 : i32
    %25 = vector.broadcast %c2_i32_11 : i32 to vector<8x4xi32>
    %26 = arith.muli %25, %24 : vector<8x4xi32>
    %27 = arith.cmpi eq, %23, %26 : vector<8x4xi32>
    %c2_i32_12 = arith.constant 2 : i32
    %28 = vector.broadcast %c2_i32_12 : i32 to vector<8x4xi32>
    %29 = arith.muli %28, %24 : vector<8x4xi32>
    %c1_i32_13 = arith.constant 1 : i32
    %30 = vector.broadcast %c1_i32_13 : i32 to vector<8x4xi32>
    %31 = arith.addi %29, %30 : vector<8x4xi32>
    %32 = arith.cmpi eq, %23, %31 : vector<8x4xi32>
    %33 = arith.ori %27, %32 : vector<8x4xi1>
    %cst_14 = arith.constant 5.000000e-01 : f32
    %cst_15 = arith.constant 0.000000e+00 : f32
    %34 = vector.broadcast %cst_14 : f32 to vector<8x4xf32>
    %35 = vector.broadcast %cst_15 : f32 to vector<8x4xf32>
    %36 = arith.select %33, %34, %35 : vector<8x4xi1>, vector<8x4xf32>
    %c0_16 = arith.constant 0 : index
    %c0_17 = arith.constant 0 : index
    %c0_18 = arith.constant 0 : index
    %37 = tpu.strided_load %arg2[%c0_16, %c0_17, %c0_18] {strides = array<i32: 1, 2, 1>} : memref<2x8x8xf32, #tpu.memory_space<vmem>>, vector<2x4x8xf32>
    %c0_19 = arith.constant 0 : index
    %c1_20 = arith.constant 1 : index
    %c0_21 = arith.constant 0 : index
    %38 = tpu.strided_load %arg2[%c0_19, %c1_20, %c0_21] {strides = array<i32: 1, 2, 1>} : memref<2x8x8xf32, #tpu.memory_space<vmem>>, vector<2x4x8xf32>
    %39 = arith.addf %37, %38 : vector<2x4x8xf32>
    %cst_22 = arith.constant 5.000000e-01 : f32
    %40 = vector.broadcast %cst_22 : f32 to vector<2x4x8xf32>
    %41 = arith.mulf %39, %40 : vector<2x4x8xf32>
    %42 = vector.shape_cast %41 : vector<2x4x8xf32> to vector<8x8xf32>
    %cst_23 = arith.constant dense<0.000000e+00> : vector<8x4xf32>
    %43 = tpu.matmul %42, %36, %cst_23 {dimension_numbers = #tpu.dot_dimension_numbers<[1], [0], [0], [1], [0, 0, 1, 1], [], []>} : vector<8x8xf32>, vector<8x4xf32>, vector<8x4xf32> -> vector<8x4xf32>
    %44 = vector.shape_cast %43 : vector<8x4xf32> to vector<2x4x4xf32>
    %c0_24 = arith.constant 0 : index
    %c0_25 = arith.constant 0 : index
    %c0_26 = arith.constant 0 : index
    %45 = vector.load %arg3[%c0_24, %c0_25, %c0_26] : memref<2x4x4xf32, #tpu.memory_space<vmem>>, vector<2x4x4xf32>
    tpu.vector_store %arg3[%c0_24, %c0_25, %c0_26], %44 {strides = array<i32>} : memref<2x4x4xf32, #tpu.memory_space<vmem>>, vector<2x4x4xf32>,
    %46 = tpu.iota {dimensions = array<i32: 0>} : vector<4x2xi32>
    %47 = tpu.iota {dimensions = array<i32: 1>} : vector<4x2xi32>
    %c2_i32_27 = arith.constant 2 : i32
    %48 = vector.broadcast %c2_i32_27 : i32 to vector<4x2xi32>
    %49 = arith.muli %48, %47 : vector<4x2xi32>
    %50 = arith.cmpi eq, %46, %49 : vector<4x2xi32>
    %c2_i32_28 = arith.constant 2 : i32
    %51 = vector.broadcast %c2_i32_28 : i32 to vector<4x2xi32>
    %52 = arith.muli %51, %47 : vector<4x2xi32>
    %c1_i32_29 = arith.constant 1 : i32
    %53 = vector.broadcast %c1_i32_29 : i32 to vector<4x2xi32>
    %54 = arith.addi %52, %53 : vector<4x2xi32>
    %55 = arith.cmpi eq, %46, %54 : vector<4x2xi32>
    %56 = arith.ori %50, %55 : vector<4x2xi1>
    %cst_30 = arith.constant 5.000000e-01 : f32
    %cst_31 = arith.constant 0.000000e+00 : f32
    %57 = vector.broadcast %cst_30 : f32 to vector<4x2xf32>
    %58 = vector.broadcast %cst_31 : f32 to vector<4x2xf32>
    %59 = arith.select %56, %57, %58 : vector<4x2xi1>, vector<4x2xf32>
    %c0_32 = arith.constant 0 : index
    %c0_33 = arith.constant 0 : index
    %c0_34 = arith.constant 0 : index
    %60 = tpu.strided_load %arg3[%c0_32, %c0_33, %c0_34] {strides = array<i32: 1, 2, 1>} : memref<2x4x4xf32, #tpu.memory_space<vmem>>, vector<2x2x4xf32>
    %c0_35 = arith.constant 0 : index
    %c1_36 = arith.constant 1 : index
    %c0_37 = arith.constant 0 : index
    %61 = tpu.strided_load %arg3[%c0_35, %c1_36, %c0_37] {strides = array<i32: 1, 2, 1>} : memref<2x4x4xf32, #tpu.memory_space<vmem>>, vector<2x2x4xf32>
    %62 = arith.addf %60, %61 : vector<2x2x4xf32>
    %cst_38 = arith.constant 5.000000e-01 : f32
    %63 = vector.broadcast %cst_38 : f32 to vector<2x2x4xf32>
    %64 = arith.mulf %62, %63 : vector<2x2x4xf32>
    %65 = vector.shape_cast %64 : vector<2x2x4xf32> to vector<4x4xf32>
    %cst_39 = arith.constant dense<0.000000e+00> : vector<4x2xf32>
    %66 = tpu.matmul %65, %59, %cst_39 {dimension_numbers = #tpu.dot_dimension_numbers<[1], [0], [0], [1], [0, 0, 1, 1], [], []>} : vector<4x4xf32>, vector<4x2xf32>, vector<4x2xf32> -> vector<4x2xf32>
    %67 = vector.shape_cast %66 : vector<4x2xf32> to vector<2x2x2xf32>
    %c0_40 = arith.constant 0 : index
    %c0_41 = arith.constant 0 : index
    %c0_42 = arith.constant 0 : index
    %68 = vector.load %arg4[%c0_40, %c0_41, %c0_42] : memref<2x2x2xf32, #tpu.memory_space<vmem>>, vector<2x2x2xf32>
    tpu.vector_store %arg4[%c0_40, %c0_41, %c0_42], %67 {strides = array<i32>} : memref<2x2x2xf32, #tpu.memory_space<vmem>>, vector<2x2x2xf32>,
    return
  }
  func.func @transform_0(%arg0: i32) -> (i32, i32, i32) {
    %c0_i32 = arith.constant 0 : i32
    %c0_i32_0 = arith.constant 0 : i32
    %c0_i32_1 = arith.constant 0 : i32
    return %arg0, %c0_i32, %c0_i32_0 : i32, i32, i32
  }
  func.func @transform_1(%arg0: i32) -> (i32, i32, i32) {
    %c0_i32 = arith.constant 0 : i32
    %c0_i32_0 = arith.constant 0 : i32
    %c0_i32_1 = arith.constant 0 : i32
    return %arg0, %c0_i32, %c0_i32_0 : i32, i32, i32
  }
  func.func @transform_2(%arg0: i32) -> (i32, i32, i32) {
    %c0_i32 = arith.constant 0 : i32
    %c0_i32_0 = arith.constant 0 : i32
    %c0_i32_1 = arith.constant 0 : i32
    return %arg0, %c0_i32, %c0_i32_0 : i32, i32, i32
  }
  func.func @transform_3(%arg0: i32) -> (i32, i32, i32) {
    %c0_i32 = arith.constant 0 : i32
    %c0_i32_0 = arith.constant 0 : i32
    %c0_i32_1 = arith.constant 0 : i32
    return %arg0, %c0_i32, %c0_i32_0 : i32, i32, i32
  }
}

</mosaic_0001>

<bundles_post_ra>
// kernel: _avgpool_forward_impl.1
= control target key start
LH: loop header
LB: loop body
LE: loop exit
PB: predicated region body
PF: predicated region fallthrough
CT: control target
= control target key end

     0   :  { %9 = vsyncpa [#allocation3], 0  ;;  %s991_s0 = inlined_call_operand.hbm [shape: f32[8,16,16], index: 0, kind: input, shape index: {}]   ;;  %s992_s1 = inlined_call_operand.hbm [shape: f32[8,8,8], index: 1, kind: output, shape index: {0}]   ;;  %s993_s2 = inlined_call_operand.hbm [shape: f32[8,4,4], index: 2, kind: output, shape index: {1}]   ;;  %s994_s3 = inlined_call_operand.vmem [shape: f32[8,2,2], index: 3, kind: output, shape index: {2}]  }
   0x1   :  { %11 = vsyncpa [#allocation3 + $0x1], 0 }
   0x2   :  { %12 = vsyncpa [#allocation4], 0 }
   0x3   :  { %14 = vsyncpa [#allocation4 + $0x1], 0 }
   0x4   :  { %15 = vsyncpa [#allocation7], 0 }
   0x5   :  { %17 = vsyncpa [#allocation7 + $0x1], 0  ;;  %s812_s12 = smov 0   ;;  %s814_s13 = smov 0  }
   0x6   :  { %s816_s14 = smov 0   ;;  %s818_s15 = smov 0  }
   0x7 LB: > { %s833_s16 = sadd.s32 4294967295, %s782_s15   ;;  %s551_s17 = sadd.s32 4294967294, %s782_s15   ;;  %s782_s15 = sphi %s818_s15, %s1005_s15   ;;  %s778_s14 = sphi %s816_s14, %s1004_s14   ;;  %s774_s13 = sphi %s814_s13, %s1003_s13   ;;  %s770_s12 = sphi %s812_s12, %s1002_s12  }
   0x8   : > { %s837_s18 = sadd.s32 1, %s782_s15   ;;  %s30_s19 = sadd.s32 1, %s778_s14 }
   0x9   : > { %s27_s20 = ssub.s32 %s782_s15, %s837_s18  ;;  %p37_p0 = scmp.ne.s32.totalorder %s778_s14, %s774_s13 }
   0xa   : > { %p28_p1 = scmp.eq.s32.totalorder %s27_s20, 0  ;;  %p38_p2 = scmp.eq.s32.totalorder %s782_s15, 0 }
   0xb   : > { %p43_p3 = scmp.ne.s32.totalorder %s774_s13, %s770_s12  ;;  %p44_p4 = scmp.eq.s32.totalorder %s833_s16, 0 }
   0xc   : > { %s849_s21 = scalar_select %p28_p1, %s778_s14, %s30_s19  }
   0xd   : > { %p851_p5 = por %p38_p2, %p37_p0  ;;  %p855_p6 = por %p44_p4, %p43_p3 }
   0xe   : > { %p67_p7 = scmp.eq.s32.totalorder %s833_s16, 3  ;;  %p73_p8 = scmp.eq.s32.totalorder %s551_s17, 3 }
   0xf   : > { %p612_p9 = scmp.lt.s32.totalorder %s782_s15, 4  ;;  %s145_s26 = sand.u32 1, %s778_s14  }
  0x10   : > { %p861_p10 = por %p67_p7, %p37_p0  ;;  %p865_p11 = por %p73_p8, %p43_p3 }
  0x11   : > { %s590_s27 = sshll.u32 %s782_s15, 5  ;;  %s554_s28 = sshll.u32 %s145_s26, 5 }
  0x12   : > { %s155_s4 = scalar_lea.hbm %s991_s0, %s590_s27  ;;  %s149_s6 = scalar_lea.vmem [#allocation2], %s554_s28 }
  0x13   : > { %s156_s5 = sshll.u32 %s155_s4, 4  ;;  %s158_s7 = sshll.u32 %s149_s6, 4  ;;  %s157_s5 = int_to_ptr.hbm [resolvable:$true] %s156_s5  ;;  %s159_s7 = int_to_ptr.vmem [resolvable:$true] %s158_s7 }
  0x14   : > { %p876_p12 = pnand %p612_p9, %p851_p5  ;;  %p558_p13 = scmp.ge.s32.totalorder %s782_s15, 1 }
  0x15   : > { %p166_p0 = scmp.lt.s32.totalorder %s782_s15, 5  ;;  %s146_s9 = scalar_lea.sflag [#allocation3], %s145_s26 }
  0x16   : > { %s654_s10 = sshra.s32 %s157_s5, 4  ;;  %p658_p2 = pneg %p876_p12  ;;  %s655_s10 = int_to_ptr.hbm [resolvable:$true] %s654_s10 }
  0x17   : > { %s656_s11 = scalar_lea.hbm %s655_s10, 32  ;;  %s661_s20 = scalar_lea.hbm %s991_s0, 128 }
  0x18   : > { %p657_p1 = scmp.ne.s32.totalorder %s655_s10, %s656_s11  ;;  %p662_p5 = scmp.lt.s32.totalorder %s655_s10, %s991_s0 }
  0x19   : > { %p663_p7 = scmp.lt.s32.totalorder %s661_s20, %s656_s11 }
  0x1a   : > { %p659_p3 = pnand %p658_p2, %p657_p1 }
  0x1b   : > { %p664_p8 = por %p663_p7, %p662_p5 }
  0x1c   : > { %p660_p4 = pneg %p659_p3 }
  0x1e   : > { %p665_p9 = pnand %p664_p8, %p660_p4 }
  0x20   : > { %668 = shalt.err (!%p665_p9)
}
  0x21   : > { %s784_s26 = smov 128   ;;  %s785_s28 = smov 8  }
  0x22   : > { %604 = dma.hbm_to_vmem [thread:$0]  (!%p876_p12), %s157_s5, 512, %s159_s7, %s146_s9, %s784_s26, %s784_s26, %s785_s28  }
  0x23   : > { %p167_p1 = pnand %p558_p13, %p166_p0 }
  0x24   : > { %s897_s29 = sand.u32 (!%p167_p1), 1, %s774_s13  }
  0x25   : > { %170 = sbr.rel (%p167_p1) target bundleno = 491 (0x1eb), region = 24  ;;  %s559_s30 = sshll.u32 (!%p167_p1), %s897_s29, 5 }
  0x26   : > { %s173_s4 = scalar_lea.sflag (!%p167_p1), [#allocation3], %s897_s29  ;;  %s176_s6 = scalar_lea.vmem (!%p167_p1), [#allocation2], %s559_s30 }
  0x2a   : > { %757 = dma.done.wait (%p855_p6), %s173_s4, 512  }
  0x2b   : > { %759 = vsyncadd (%p855_p6), %s173_s4, 4294966784  ;;  %v219_v0 = vlaneseq  ;;  %v564_v6 = vld [vmem:[%s176_s6 + $0x10] ss:$2 sm:$0xff]  ;;  %v566_v7 = vld [vmem:[%s176_s6 + $0x11] ss:$2 sm:$0xff]  ;;  %v786_v12 = vmov 0.5  }
  0x2c   : > { %v234_v8 = vld [vmem:[%s176_s6] ss:$2 sm:$0xff]  ;;  %v242_v9 = vadd.f32 %v566_v7, %v564_v6  ;;  %v565_v10 = vld [vmem:[%s176_s6 + $0x1] ss:$2 sm:$0xff]  ;;  %vm245_vm6 = vcmask 130048   ;;  %s560_s23 = sshll.u32 %s897_s29, 4 }
  0x2d   : > { %v220_v1 = vshrl.u32 %v219_v0, 7  ;;  %v223_v2 = vand.u32 127, %v219_v0  ;;  %v241_v11 = vadd.f32 %v565_v10, %v234_v8  ;;  %vm275_vm7 = vcmask 64512   ;;  %s916_s5 = scalar_lea.vmem [#allocation5], %s560_s23  ;;  %s561_s7 = sshll.u32 %s897_s29, 3 }
  0x2e   : > { %v244_v14 = vmul.f32 0.5, %v242_v9  ;;  %vm343_vm8 = vcmask 1043456   ;;  %v787_v27 = vmov 0.0   ;;  %vm320_vm9 = vcmask 27648   ;;  %s930_s8 = scalar_lea.vmem [#allocation6], %s561_s7  ;;  %s591_s9 = sshll.u32 %s833_s16, 4 }
  0x2f   : > { %v221_v3 = vadd.s32 8, %v220_v1  ;;  %v224_v4 = vmul.u32 2, %v223_v2  ;;  %v243_v15 = vmul.f32 0.5, %v241_v11  ;;  %vm340_vm10 = vcmask 31744   ;;  %s592_s10 = sshll.u32 %s833_s16, 3  ;;  %s395_s19 = scalar_lea.hbm %s992_s1, %s591_s9 }
  0x30   : > { %s412_s27 = scalar_lea.hbm %s993_s2, %s592_s10  ;;  %s396_s26 = sshll.u32 %s916_s5, 4  ;;  %s397_s26 = int_to_ptr.vmem [resolvable:$true] %s396_s26 }
  0x31   : > { %vm226_vm0 = vcmp.eq.s32.totalorder %v221_v3, %v224_v4  ;;  %v227_v5 = vadd.s32 1, %v224_v4  ;;  %vm225_vm1 = vcmp.eq.s32.totalorder %v220_v1, %v224_v4  ;;  %s398_s28 = sshll.u32 %s395_s19, 4  ;;  %s374_s30 = scalar_lea.sflag [#allocation4], %s897_s29  ;;  %s399_s28 = int_to_ptr.hbm [resolvable:$true] %s398_s28 }
  0x32   : > { %s698_s4 = sshra.s32 %s399_s28, 4  ;;  %s704_s9 = scalar_lea.hbm %s992_s1, 64  ;;  %s699_s4 = int_to_ptr.hbm [resolvable:$true] %s698_s4 }
  0x33   : > { %vm229_vm2 = vcmp.eq.s32.totalorder %v221_v3, %v227_v5  ;;  %vm228_vm3 = vcmp.eq.s32.totalorder %v220_v1, %v227_v5  ;;  %s700_s6 = scalar_lea.hbm %s699_s4, 16  ;;  %p705_p0 = scmp.lt.s32.totalorder %s699_s4, %s992_s1 }
  0x34   : > { %vm231_vm4 = vmor %vm226_vm0, %vm229_vm2  ;;  %p701_p6 = scmp.ne.s32.totalorder %s699_s4, %s700_s6  ;;  %p706_p2 = scmp.lt.s32.totalorder %s704_s9, %s700_s6 }
  0x35   : > { %593 = vmatpush.msk.msra.mxu3 %vm231_vm4, %v786_v12  ;;  %vm905_vm5 = vmor %vm225_vm1, %vm228_vm3  ;;  %567 = vmatpush.msk.msra.mxu0 %vm231_vm4, %v786_v12 }
  0x36   : > { %574 = vmatpush.msk.msra.mxu1 %vm905_vm5, %v786_v12  ;;  %v232_v28 = vsel %vm905_vm5, 0.5, %v787_v27  ;;  %p702_p12 = pnand %p701_p6, %p861_p10  ;;  %p707_p3 = por %p706_p2, %p705_p0 }
  0x37   : > { %594 = vmatpush.msk.msra.mxu3 %vm905_vm5, %v786_v12  ;;  %568 = vmatpush.msk.msra.mxu0 %vm905_vm5, %v786_v12 }
  0x38   : > { %570 = vmatmul.msk.f32.vlgmr.msra.gmra.mxu3 %vm245_vm6, %v244_v14  ;;  %569 = vmatmul.msk.f32.vlgmr.msra.gmra.mxu0 %vm245_vm6, %v243_v15  ;;  %p703_p13 = pneg %p702_p12 }
  0x39   : > { %579 = vmatpush.msk.msra.mxu2 %vm343_vm8, %v232_v28 }
  0x3a   : > { %p708_p4 = pnand %p707_p3, %p703_p13 }
  0xb5   : > { %v269_v16 = vpop.f32.mrf.mxu0 }
  0xb6   : > { %276 = vst.msk [vmem:[%s916_s5] sm:$0xff] %vm275_vm7, %v269_v16 }
  0xbb   : > { %v272_v17 = vpop.f32.mrf.mxu3 }
  0xbc   : > { %277 = vst.msk [vmem:[%s916_s5 + $0x8] sm:$0xff] %vm275_vm7, %v272_v17 }
  0xbd   : > { %v278_v18 = vld [vmem:[%s916_s5] ss:$2 sm:$0xf]  ;;  %v572_v19 = vld [vmem:[%s916_s5 + $0x1] ss:$2 sm:$0xf] }
  0xbe   : > { %v285_v20 = vadd.f32 %v572_v19, %v278_v18 }
  0xc0   : > { %v287_v21 = vmul.f32 0.5, %v285_v20 }
  0xc2   : > { %291 = vst [vmem:[#allocation1] ss:$2 sm:$0xff] %v287_v21 }
  0xc3   : > { %v571_v22 = vld [vmem:[%s916_s5 + $0x8] ss:$2 sm:$0xf]  ;;  %v573_v23 = vld [vmem:[%s916_s5 + $0x9] ss:$2 sm:$0xf] }
  0xc4   : > { %v286_v24 = vadd.f32 %v573_v23, %v571_v22 }
  0xc6   : > { %v288_v25 = vmul.f32 0.5, %v286_v24 }
  0xc8   : > { %293 = vst [vmem:[#allocation1 + $0x1] ss:$2 sm:$0xff] %v288_v25 }
  0xcf   : > { %v294_v26 = vld.sshfl [vmem:[#allocation1] sm:$0xff pattern:$0x75316420] }
  0xd0   : > { %575 = vmatmul.msk.f32.vlgmr.msra.gmra.mxu1 %vm275_vm7, %v294_v26 }
 0x14d   : > { %v314_v29 = vpop.f32.mrf.mxu1 }
 0x14e   : > { %v318_v30 = vrot.slane %v314_v29, 4  ;;  %321 = vst.msk [vmem:[%s930_s8] sm:$0xf] %vm320_vm9, %v314_v29 }
 0x150   : > { %322 = vst.msk [vmem:[%s930_s8 + $0x4] sm:$0xf] %vm320_vm9, %v318_v30 }
 0x155   : > { %v323_v31 = vld [vmem:[%s930_s8] ss:$2 sm:$0x3]  ;;  %v577_v32 = vld [vmem:[%s930_s8 + $0x1] ss:$2 sm:$0x3] }
 0x156   : > { %v330_v33 = vadd.f32 %v577_v32, %v323_v31 }
 0x157   : > { %v576_v34 = vld [vmem:[%s930_s8 + $0x4] ss:$2 sm:$0x3]  ;;  %v578_v35 = vld [vmem:[%s930_s8 + $0x5] ss:$2 sm:$0x3] }
 0x158   : > { %v331_v36 = vadd.f32 %v578_v35, %v576_v34  ;;  %v332_v37 = vmul.f32 0.5, %v330_v33 }
 0x15a   : > { %v333_v38 = vmul.f32 0.5, %v331_v36  ;;  %336 = vst [vmem:[#allocation1] ss:$4 sm:$0xff] %v332_v37 }
 0x15c   : > { %338 = vst [vmem:[#allocation1 + $0x1] ss:$4 sm:$0xff] %v333_v38 }
 0x163   : > { %v339_v39 = vld.sshfl [vmem:[#allocation1] sm:$0xff pattern:$0x73625140] }
 0x164   : > { %580 = vmatmul.msk.f32.vlgmr.msra.gmra.mxu2 %vm340_vm10, %v339_v39 }
 0x165   : > { %711 = shalt.err (!%p708_p4)
}
 0x166   : > { %s788_s5 = smov 128   ;;  %s789_s10 = smov 8  }
 0x167   : > { %597 = dma.vmem_to_hbm [thread:$0]  (%p861_p10), %s397_s26, 256, %s399_s28, %s374_s30, %s788_s5, %s788_s5, %s789_s10  }
 0x168   : > { %s413_s19 = sshll.u32 %s930_s8, 4  ;;  %s415_s20 = sshll.u32 %s412_s27, 4  ;;  %s414_s19 = int_to_ptr.vmem [resolvable:$true] %s413_s19  ;;  %s416_s20 = int_to_ptr.hbm [resolvable:$true] %s415_s20 }
 0x169   : > { %s379_s22 = scalar_lea.sflag [#allocation7], %s897_s29  ;;  %s726_s23 = sshra.s32 %s416_s20, 4  ;;  %s727_s23 = int_to_ptr.hbm [resolvable:$true] %s726_s23 }
 0x16a   : > { %s728_s4 = scalar_lea.hbm %s727_s23, 8  ;;  %s732_s9 = scalar_lea.hbm %s993_s2, 32 }
 0x16b   : > { %p729_p5 = scmp.ne.s32.totalorder %s727_s23, %s728_s4  ;;  %p733_p9 = scmp.lt.s32.totalorder %s727_s23, %s993_s2 }
 0x16c   : > { %p734_p1 = scmp.lt.s32.totalorder %s732_s9, %s728_s4 }
 0x16d   : > { %p730_p7 = pnand %p729_p5, %p861_p10 }
 0x16e   : > { %p735_p6 = por %p734_p1, %p733_p9 }
 0x16f   : > { %p731_p8 = pneg %p730_p7 }
 0x171   : > { %p736_p12 = pnand %p735_p6, %p731_p8 }
 0x173   : > { %739 = shalt.err (!%p736_p12)
}
 0x174   : > { %s790_s29 = smov 64   ;;  %s791_s8 = smov 4   ;;  %vm370_vm11 = vcmask 9216  }
 0x175   : > { %598 = dma.vmem_to_hbm [thread:$0]  (%p861_p10), %s414_s19, 128, %s416_s20, %s379_s22, %s790_s29, %s790_s29, %s791_s8  }
 0x176   : > { %s562_s27 = sshll.u32 %s833_s16, 1 }
 0x177   : > { %p214_p13 = scmp.lt.s32.totalorder %s562_s27, 7 }
 0x179   : > { %s1007_s27 = smov (!%p214_p13, %s562_s27), 7 }
 0x17a   : > { %s563_s26 = sshll.u32 %s1007_s27, 1 }
 0x17b   : > { %s217_s5 = scalar_lea.vmem %s994_s3, %s563_s26 }
 0x1e7   : > { %v364_v40 = vpop.f32.mrf.mxu2 }
 0x1e8   : > { %v368_v41 = vrot.slane %v364_v40, 2  ;;  %371 = vst.msk [vmem:[%s217_s5] sm:$0x3] %vm370_vm11, %v364_v40 }
 0x1ea   : > { %372 = vst.msk [vmem:[%s217_s5 + $0x2] sm:$0x3] %vm370_vm11, %v368_v41 }
 0x1eb PF: > { %p613_p0 = scmp.ge.s32.totalorder %s782_s15, 2  ;;  %s434_s24 = sand.u32 1, %s770_s12  }
 0x1ec   : > { %s435_s16 = scalar_lea.sflag [#allocation4], %s434_s24 }
 0x1ed   : > { %p606_p10 = pnand %p613_p0, %p865_p11 }
 0x1ef   : > { %p607_p2 = pneg %p606_p10 }
 0x1f1   : > { %761 = dma.done.wait (%p607_p2), %s435_s16, 256  }
 0x1f2   : > { %763 = vsyncadd (%p607_p2), %s435_s16, 4294967040  ;;  %s445_s10 = scalar_lea.sflag [#allocation7], %s434_s24 }
 0x1f3   : > { %765 = dma.done.wait (%p607_p2), %s445_s10, 128  }
 0x1f4   : > { %767 = vsyncadd (%p607_p2), %s445_s10, 4294967168  ;;  %p20_p3 = scmp.ge.s32.totalorder %s837_s18, 6   ;;  %s1002_s12 = smov %s774_s13 }
 0x1f5   : > { %s1003_s13 = smov %s778_s14  ;;  %s1004_s14 = smov %s849_s21 }
 0x1f6   : > { %s1005_s15 = smov %s837_s18  ;;  %22 = sbr.rel (!%p20_p3) target bundleno = 7 (0x7), region = 109 }
 0x1fb   :  { %459 = vsyncpa [#allocation3], 1 }
 0x1fc   :  { %461 = vsyncpa [#allocation3 + $0x1], 1 }
 0x1fd   :  { %462 = vsyncpa [#allocation4], 1 }
 0x1fe   :  { %464 = vsyncpa [#allocation4 + $0x1], 1 }
 0x1ff   :  { %465 = vsyncpa [#allocation7], 1 }
 0x200   :  { %467 = vsyncpa [#allocation7 + $0x1], 1 }

</bundles_post_ra>
